<compile_context>
chip_gen: v7x
topology: tpu7x:2x2x1
jax: 0.10.0
libtpu: 0.0.40
codegen_flags: <defaults>
</compile_context>

<pallas_src>
import functools

import jax
import jax.numpy as jnp
from jax.experimental import pallas as pl
from jax.experimental.pallas import tpu as pltpu


_VMEM_BUDGET = 24 * 1024 * 1024   # rough live-bytes budget used to size the batch tile
_VMEM_LIMIT = 48 * 1024 * 1024    # explicit scoped-VMEM limit (fits v7x's 64 MiB/TC;
                                  # v5e's default scoped limit is only 16 MiB)


def _packed_kernel(emb_ref, w1_ref, b1_ref, w2_ref, b2_ref, out_ref, *,
                   n, d, out_lanes):
    """Small-D path.

    emb_ref: (TB, N*D) f32 -- one batch element per row (its N set-embeddings
    side by side).  w*_ref: (N*D, N*D) bf16 block-diagonal.  b*_ref: (1, N*D)
    f32 (bias tiled N times).  out_ref: (TB, out_lanes) f32 lane-dense slab.
    """
    x = emb_ref[...]                                     # (TB, N*D) f32
    xb = x.astype(jnp.bfloat16)                          # cast only at the MXU feed

    # Both linears as one lane-dense MXU pass each (block-diagonal weights make a
    # single (N*D, N*D) dot == N independent (D, D) dots per row).  f32 accumulate.
    h = jnp.dot(xb, w1_ref[...], preferred_element_type=jnp.float32) + b1_ref[...]
    h = jnp.maximum(h, 0.0)
    s = jnp.dot(h.astype(jnp.bfloat16), w2_ref[...],
                preferred_element_type=jnp.float32) + b2_ref[...]    # (TB, N*D) f32

    # Softmax over the set axis == all-reduce across the N lane-groups of width D.
    # Cyclic-roll butterfly: log2(N) XLU rotations; result replicated per group.
    def group_allreduce(v, op):
        shift = d
        while shift < n * d:
            v = op(v, pltpu.roll(v, shift=shift, axis=1))
            shift *= 2
        return v

    m = group_allreduce(s, jnp.maximum)                  # per-(b, d) max (stability)
    e = jnp.exp(s - m)                                   # f32 EUP exp (v5e-safe)
    denom = group_allreduce(e, jnp.add)                  # softmax denominator
    num = group_allreduce(e * x, jnp.add)                # sum_n e_n * x_n

    # Deferred normalization on the already-reduced tensor (EUP reciprocal).
    out = num * pl.reciprocal(denom, approx=True)        # (TB, N*D), replicated
    # Every lane-group holds the same D answers; store a lane-dense slab and let
    # the wrapper keep columns [:D].
    out_ref[...] = out[:, :out_lanes]


def _flat_kernel(emb_ref, w1_ref, b1_ref, w2_ref, b2_ref, out_ref):
    """General path (D >= 128, or N not a power of two)."""
    tb, n, d = emb_ref.shape
    x = emb_ref[...]                                     # (TB, N, D) f32
    x2 = x.reshape(tb * n, d)                            # collapse leading dims only

    h = jnp.dot(x2.astype(jnp.bfloat16), w1_ref[...],
                preferred_element_type=jnp.float32) + b1_ref[...]
    h = jnp.maximum(h, 0.0)
    s = jnp.dot(h.astype(jnp.bfloat16), w2_ref[...],
                preferred_element_type=jnp.float32) + b2_ref[...]
    s = s.reshape(tb, n, d)                              # (TB, N, D) f32

    m = jnp.max(s, axis=1, keepdims=True)
    e = jnp.exp(s - m)                                   # (TB, N, D) f32
    denom = jnp.sum(e, axis=1)                           # (TB, D)
    num = jnp.sum(e * x, axis=1)                         # (TB, D) deferred normalization
    out_ref[...] = num * pl.reciprocal(denom, approx=True)


def _choose_tb(batch, block_b):
    """Batch-tile size: amortizes per-step overhead, gives >=2 grid steps when
    possible (feeds both TensorCores on v7x) and prefers a divisor of the batch
    so no jnp.pad HBM copy of the embeddings is needed."""
    tb = min(block_b, batch)
    if tb == batch and batch > 8:
        tb = -(-batch // 2)                     # at least 2 grid steps
    if batch % tb:
        for cand in range(tb, tb // 2, -1):     # nearby divisor (never shrink >2x)
            if batch % cand == 0:
                return cand
    return tb


@functools.partial(jax.jit, static_argnames=("block_b",))
def intersection_net(embeddings, w1_t, b1, w2_t, b2, *, block_b=1024):
    """embeddings: (B, N, D) f32; w*_t: (D, D) (already transposed vs torch);
    b*: (1, D).  Returns (B, D) f32."""
    B, N, D = embeddings.shape

    # Tile cap from a VMEM budget (~12 live f32 (N*D)-wide temporaries per row,
    # incl. the double-buffered input block) -- stays well inside v7x's 64 MiB/TC.
    bytes_per_row = 12 * N * D * 4
    tb_cap = max(8, _VMEM_BUDGET // bytes_per_row)
    tb = _choose_tb(B, min(block_b, tb_cap))
    num_blocks = pl.cdiv(B, tb)
    b_pad = num_blocks * tb

    w1 = w1_t.astype(jnp.bfloat16)
    w2 = w2_t.astype(jnp.bfloat16)
    b1 = b1.astype(jnp.float32)
    b2 = b2.astype(jnp.float32)

    compiler_params = pltpu.CompilerParams(
        dimension_semantics=("parallel",), vmem_limit_bytes=_VMEM_LIMIT)

    packed = (D < 128 and N >= 2 and (N & (N - 1)) == 0
              and (N * D) % 128 == 0 and N * D <= 1024)

    if packed:
        out_lanes = 128                              # lane-dense output slab
        emb2 = embeddings.reshape(B, N * D)          # free row-major reshape, stays f32
        if b_pad != B:
            emb2 = jnp.pad(emb2, ((0, b_pad - B), (0, 0)))
        # Block-diagonal weights: one (N*D, N*D) dot == N independent (D, D) dots.
        eye = jnp.eye(N, dtype=jnp.bfloat16)
        w1p, w2p = jnp.kron(eye, w1), jnp.kron(eye, w2)
        b1p, b2p = jnp.tile(b1, (1, N)), jnp.tile(b2, (1, N))

        kernel = functools.partial(_packed_kernel, n=N, d=D, out_lanes=out_lanes)
        out = pl.pallas_call(
            kernel,
            out_shape=jax.ShapeDtypeStruct((b_pad, out_lanes), jnp.float32),
            grid_spec=pltpu.PrefetchScalarGridSpec(
                num_scalar_prefetch=0,
                grid=(num_blocks,),
                in_specs=[
                    pl.BlockSpec((tb, N * D), lambda i: (i, 0)),
                    pl.BlockSpec((N * D, N * D), lambda i: (0, 0)),
                    pl.BlockSpec((1, N * D), lambda i: (0, 0)),
                    pl.BlockSpec((N * D, N * D), lambda i: (0, 0)),
                    pl.BlockSpec((1, N * D), lambda i: (0, 0)),
                ],
                out_specs=pl.BlockSpec((tb, out_lanes), lambda i: (i, 0)),
            ),
            compiler_params=compiler_params,
        )(emb2, w1p, b1p, w2p, b2p)
        return out[:B, :D]

    # General path (D >= 128 and/or N not a power of two).
    emb = embeddings
    if b_pad != B:
        emb = jnp.pad(emb, ((0, b_pad - B), (0, 0), (0, 0)))
    out = pl.pallas_call(
        _flat_kernel,
        out_shape=jax.ShapeDtypeStruct((b_pad, D), jnp.float32),
        grid_spec=pltpu.PrefetchScalarGridSpec(
            num_scalar_prefetch=0,
            grid=(num_blocks,),
            in_specs=[
                pl.BlockSpec((tb, N, D), lambda i: (i, 0, 0)),
                pl.BlockSpec((D, D), lambda i: (0, 0)),
                pl.BlockSpec((1, D), lambda i: (0, 0)),
                pl.BlockSpec((D, D), lambda i: (0, 0)),
                pl.BlockSpec((1, D), lambda i: (0, 0)),
            ],
            out_specs=pl.BlockSpec((tb, D), lambda i: (i, 0)),
        ),
        compiler_params=compiler_params,
    )(emb, w1, b1, w2, b2)
    return out[:B]


def init_params(key, dim):
    """Deterministic params matching the module: xavier_uniform weights, torch-default
    uniform biases.  Returned weights are pre-transposed (kernel computes x @ W)."""
    k1, k2, k3, k4 = jax.random.split(key, 4)
    limit_w = (6.0 / (dim + dim)) ** 0.5
    limit_b = 1.0 / (dim ** 0.5)
    w1 = jax.random.uniform(k1, (dim, dim), jnp.float32, -limit_w, limit_w)
    w2 = jax.random.uniform(k2, (dim, dim), jnp.float32, -limit_w, limit_w)
    b1 = jax.random.uniform(k3, (1, dim), jnp.float32, -limit_b, limit_b)
    b2 = jax.random.uniform(k4, (1, dim), jnp.float32, -limit_b, limit_b)
    return w1.T, b1, w2.T, b2


def reference(embeddings, w1_t, b1, w2_t, b2):
    h = jax.nn.relu(embeddings @ w1_t + b1)
    s = h @ w2_t + b2
    a = jax.nn.softmax(s, axis=1)
    return jnp.sum(a * embeddings, axis=1)


if __name__ == "__main__":
    # (B, N, D, block_b, tol) -- small shapes; block_b chosen so every config runs
    # several grid steps.  bf16 MXU feeds + approx reciprocal need a loose tolerance.
    configs = [
        (64, 8, 32, 16, 5e-2),    # packed path: N*D = 256 lanes, 4 grid steps
        (24, 8, 128, 8, 7.5e-2),  # general path (D >= 128), 3 grid steps
        (10, 2, 64, 64, 5e-2),    # packed path: N*D = 128; exercises the >=2-step split
    ]
    key = jax.random.PRNGKey(0)
    for idx, (B, N, D, block_b, tol) in enumerate(configs):
        key, k_emb, k_par = jax.random.split(key, 3)
        embeddings = jax.random.normal(k_emb, (B, N, D), jnp.float32)
        w1_t, b1, w2_t, b2 = init_params(k_par, D)
        out = jax.block_until_ready(
            intersection_net(embeddings, w1_t, b1, w2_t, b2, block_b=block_b))
        ref = reference(embeddings, w1_t, b1, w2_t, b2)
        assert out.shape == (B, D)
        err = float(jnp.max(jnp.abs(out - ref)))
        assert jnp.allclose(out, ref, atol=tol, rtol=tol), (idx, err)
    print("KERNEL_OK")
</pallas_src>

<mosaic_0001>
module attributes {stable_mosaic.version = 11 : i64} {
  func.func @_packed_kernel(%arg0: i32, %arg1: memref<16x256xf32, #tpu.memory_space<vmem>>, %arg2: memref<256x256xbf16, #tpu.memory_space<vmem>>, %arg3: memref<1x256xf32, #tpu.memory_space<vmem>>, %arg4: memref<256x256xbf16, #tpu.memory_space<vmem>>, %arg5: memref<1x256xf32, #tpu.memory_space<vmem>>, %arg6: memref<16x128xf32, #tpu.memory_space<vmem>>) attributes {dimension_semantics = [#tpu.dimension_semantics<parallel>], iteration_bounds = array<i64: 4>, scalar_prefetch = 0 : i64, scratch_operands = 0 : i64, tpu.core_type = #tpu.core_type<tc>, window_params = [{transform_indices = @transform_0, window_bounds = array<i64: 16, 256>}, {pipeline_mode = #tpu.pipeline_mode<synchronous>, transform_indices = @transform_1, window_bounds = array<i64: 256, 256>}, {pipeline_mode = #tpu.pipeline_mode<synchronous>, transform_indices = @transform_2, window_bounds = array<i64: 1, 256>}, {pipeline_mode = #tpu.pipeline_mode<synchronous>, transform_indices = @transform_3, window_bounds = array<i64: 256, 256>}, {pipeline_mode = #tpu.pipeline_mode<synchronous>, transform_indices = @transform_4, window_bounds = array<i64: 1, 256>}, {transform_indices = @transform_5, window_bounds = array<i64: 16, 128>}]} {
    %c0 = arith.constant 0 : index
    %c0_0 = arith.constant 0 : index
    %0 = vector.load %arg1[%c0, %c0_0] : memref<16x256xf32, #tpu.memory_space<vmem>>, vector<16x256xf32>
    %1 = arith.truncf %0 : vector<16x256xf32> to vector<16x256xbf16>
    %c0_1 = arith.constant 0 : index
    %c0_2 = arith.constant 0 : index
    %2 = vector.load %arg2[%c0_1, %c0_2] : memref<256x256xbf16, #tpu.memory_space<vmem>>, vector<256x256xbf16>
    %cst = arith.constant dense<0.000000e+00> : vector<16x256xf32>
    %3 = tpu.matmul %1, %2, %cst {dimension_numbers = #tpu.dot_dimension_numbers<[1], [0], [0], [1], [0, 0, 1, 1], [], []>} : vector<16x256xbf16>, vector<256x256xbf16>, vector<16x256xf32> -> vector<16x256xf32>
    %c0_3 = arith.constant 0 : index
    %c0_4 = arith.constant 0 : index
    %4 = vector.load %arg3[%c0_3, %c0_4] : memref<1x256xf32, #tpu.memory_space<vmem>>, vector<1x256xf32>
    %5 = vector.broadcast %4 : vector<1x256xf32> to vector<16x256xf32>
    %6 = arith.addf %3, %5 : vector<16x256xf32>
    %cst_5 = arith.constant 0.000000e+00 : f32
    %7 = vector.broadcast %cst_5 : f32 to vector<16x256xf32>
    %8 = arith.maximumf %6, %7 : vector<16x256xf32>
    %9 = arith.truncf %8 : vector<16x256xf32> to vector<16x256xbf16>
    %c0_6 = arith.constant 0 : index
    %c0_7 = arith.constant 0 : index
    %10 = vector.load %arg4[%c0_6, %c0_7] : memref<256x256xbf16, #tpu.memory_space<vmem>>, vector<256x256xbf16>
    %cst_8 = arith.constant dense<0.000000e+00> : vector<16x256xf32>
    %11 = tpu.matmul %9, %10, %cst_8 {dimension_numbers = #tpu.dot_dimension_numbers<[1], [0], [0], [1], [0, 0, 1, 1], [], []>} : vector<16x256xbf16>, vector<256x256xbf16>, vector<16x256xf32> -> vector<16x256xf32>
    %c0_9 = arith.constant 0 : index
    %c0_10 = arith.constant 0 : index
    %12 = vector.load %arg5[%c0_9, %c0_10] : memref<1x256xf32, #tpu.memory_space<vmem>>, vector<1x256xf32>
    %13 = vector.broadcast %12 : vector<1x256xf32> to vector<16x256xf32>
    %14 = arith.addf %11, %13 : vector<16x256xf32>
    %c32_i32 = arith.constant 32 : i32
    %15 = tpu.dynamic_rotate %14 by %c32_i32 dim 1 : vector<16x256xf32>, i32 -> vector<16x256xf32>
    %16 = arith.maximumf %14, %15 : vector<16x256xf32>
    %c64_i32 = arith.constant 64 : i32
    %17 = tpu.dynamic_rotate %16 by %c64_i32 dim 1 : vector<16x256xf32>, i32 -> vector<16x256xf32>
    %18 = arith.maximumf %16, %17 : vector<16x256xf32>
    %c128_i32 = arith.constant 128 : i32
    %19 = tpu.dynamic_rotate %18 by %c128_i32 dim 1 : vector<16x256xf32>, i32 -> vector<16x256xf32>
    %20 = arith.maximumf %18, %19 : vector<16x256xf32>
    %21 = arith.subf %14, %20 : vector<16x256xf32>
    %22 = math.exp %21 : vector<16x256xf32>
    %c32_i32_11 = arith.constant 32 : i32
    %23 = tpu.dynamic_rotate %22 by %c32_i32_11 dim 1 : vector<16x256xf32>, i32 -> vector<16x256xf32>
    %24 = arith.addf %22, %23 : vector<16x256xf32>
    %c64_i32_12 = arith.constant 64 : i32
    %25 = tpu.dynamic_rotate %24 by %c64_i32_12 dim 1 : vector<16x256xf32>, i32 -> vector<16x256xf32>
    %26 = arith.addf %24, %25 : vector<16x256xf32>
    %c128_i32_13 = arith.constant 128 : i32
    %27 = tpu.dynamic_rotate %26 by %c128_i32_13 dim 1 : vector<16x256xf32>, i32 -> vector<16x256xf32>
    %28 = arith.addf %26, %27 : vector<16x256xf32>
    %29 = arith.mulf %22, %0 : vector<16x256xf32>
    %c32_i32_14 = arith.constant 32 : i32
    %30 = tpu.dynamic_rotate %29 by %c32_i32_14 dim 1 : vector<16x256xf32>, i32 -> vector<16x256xf32>
    %31 = arith.addf %29, %30 : vector<16x256xf32>
    %c64_i32_15 = arith.constant 64 : i32
    %32 = tpu.dynamic_rotate %31 by %c64_i32_15 dim 1 : vector<16x256xf32>, i32 -> vector<16x256xf32>
    %33 = arith.addf %31, %32 : vector<16x256xf32>
    %c128_i32_16 = arith.constant 128 : i32
    %34 = tpu.dynamic_rotate %33 by %c128_i32_16 dim 1 : vector<16x256xf32>, i32 -> vector<16x256xf32>
    %35 = arith.addf %33, %34 : vector<16x256xf32>
    %36 = tpu.reciprocal %28 {approx = true} : vector<16x256xf32> -> vector<16x256xf32>
    %37 = arith.mulf %35, %36 : vector<16x256xf32>
    %38 = vector.extract_strided_slice %37 {offsets = [0, 0], sizes = [16, 128], strides = [1, 1]} : vector<16x256xf32> to vector<16x128xf32>
    %c0_17 = arith.constant 0 : index
    %c0_18 = arith.constant 0 : index
    %39 = vector.load %arg6[%c0_17, %c0_18] : memref<16x128xf32, #tpu.memory_space<vmem>>, vector<16x128xf32>
    tpu.vector_store %arg6[%c0_17, %c0_18], %38 {strides = array<i32>} : memref<16x128xf32, #tpu.memory_space<vmem>>, vector<16x128xf32>,
    return
  }
  func.func @transform_0(%arg0: i32) -> (i32, i32) {
    %c0_i32 = arith.constant 0 : i32
    %c0_i32_0 = arith.constant 0 : i32
    return %arg0, %c0_i32 : i32, i32
  }
  func.func @transform_1(%arg0: i32) -> (i32, i32) {
    %c0_i32 = arith.constant 0 : i32
    %c0_i32_0 = arith.constant 0 : i32
    %c0_i32_1 = arith.constant 0 : i32
    return %c0_i32, %c0_i32_0 : i32, i32
  }
  func.func @transform_2(%arg0: i32) -> (i32, i32) {
    %c0_i32 = arith.constant 0 : i32
    %c0_i32_0 = arith.constant 0 : i32
    %c0_i32_1 = arith.constant 0 : i32
    return %c0_i32, %c0_i32_0 : i32, i32
  }
  func.func @transform_3(%arg0: i32) -> (i32, i32) {
    %c0_i32 = arith.constant 0 : i32
    %c0_i32_0 = arith.constant 0 : i32
    %c0_i32_1 = arith.constant 0 : i32
    return %c0_i32, %c0_i32_0 : i32, i32
  }
  func.func @transform_4(%arg0: i32) -> (i32, i32) {
    %c0_i32 = arith.constant 0 : i32
    %c0_i32_0 = arith.constant 0 : i32
    %c0_i32_1 = arith.constant 0 : i32
    return %c0_i32, %c0_i32_0 : i32, i32
  }
  func.func @transform_5(%arg0: i32) -> (i32, i32) {
    %c0_i32 = arith.constant 0 : i32
    %c0_i32_0 = arith.constant 0 : i32
    return %arg0, %c0_i32 : i32, i32
  }
}

</mosaic_0001>

<bundles_post_ra>
// kernel: intersection_net.1
= control target key start
LH: loop header
LB: loop body
LE: loop exit
PB: predicated region body
PF: predicated region fallthrough
CT: control target
= control target key end

     0   :  { %s1156_s18 = smov 0   ;;  %s1473_s0 = inlined_call_operand.vmem [shape: f32[64,256], index: 0, kind: input, shape index: {}]   ;;  %s1474_s1 = inlined_call_operand.vmem [shape: bf16[256,256], index: 1, kind: input, shape index: {}]   ;;  %s1475_s2 = inlined_call_operand.vmem [shape: f32[1,256], index: 2, kind: input, shape index: {}]   ;;  %s1476_s3 = inlined_call_operand.vmem [shape: bf16[256,256], index: 3, kind: input, shape index: {}]   ;;  %s1477_s4 = inlined_call_operand.vmem [shape: f32[1,256], index: 4, kind: input, shape index: {}]   ;;  %s1478_s5 = inlined_call_operand.vmem [shape: f32[64,128], index: 5, kind: output, shape index: {}]  }
   0x1 LB: > { %s921_s19 = sadd.s32 4294967295, %s1122_s18   ;;  %p925_p0 = scmp.ge.s32.totalorder %s1122_s18, 1  ;;  %s1122_s18 = sphi %s1156_s18, %s15_s18  }
   0x2   : > { %p189_p1 = scmp.lt.s32.totalorder %s1122_s18, 5 }
   0x4   : > { %p190_p2 = pnand %p925_p0, %p189_p1 }
   0x5   : > { %v1008_v0 = vld [vmem:[%s1474_s1 + $0x4] ss:$8 sps:$4 sm:$0xff] (!%p190_p2)   ;;  %v1010_v1 = vld [vmem:[%s1474_s1] ss:$8 sps:$4 sm:$0xff] (!%p190_p2)   ;;  %v1011_v2 = vld [vmem:[%s1474_s1 + $0x14] ss:$8 sps:$4 sm:$0xff] (!%p190_p2)  }
   0x6   : > { %193 = sbr.rel (%p190_p2) target bundleno = 1020 (0x3fc), region = 40  ;;  %441 = vmatprep.subr.bf16.mxu0 (!%p190_p2), %v1008_v0  ;;  %v1013_v3 = vld [vmem:[%s1474_s1 + $0x10] ss:$8 sps:$4 sm:$0xff] (!%p190_p2)   ;;  %v1014_v4 = vld [vmem:[%s1474_s1 + $0x24] ss:$8 sps:$4 sm:$0xff] (!%p190_p2)   ;;  %s926_s30 = sshll.u32 (!%p190_p2), %s921_s19, 1 }
   0x7   : > { %442 = vmatpush1.bf16.msra.mxu0 (!%p190_p2), %v1010_v1  ;;  %v1016_v5 = vld [vmem:[%s1474_s1 + $0x20] ss:$8 sps:$4 sm:$0xff] (!%p190_p2)   ;;  %p219_p3 = scmp.lt.s32.totalorder (!%p190_p2), %s926_s30, 7  ;;  %v1017_v6 = vld [vmem:[%s1474_s1 + $0x34] ss:$8 sps:$4 sm:$0xff] (!%p190_p2)   ;;  %s1124_s21 = smov (!%p190_p2), 32  }
   0x8   : > { %443 = vmatprep.subr.bf16.mxu0 (!%p190_p2), %v1011_v2  ;;  %v1019_v7 = vld [vmem:[%s1474_s1 + $0x30] ss:$8 sps:$4 sm:$0xff] (!%p190_p2)   ;;  %v1020_v8 = vld [vmem:[%s1474_s1 + $0x44] ss:$8 sps:$4 sm:$0xff] (!%p190_p2)   ;;  %v1022_v9 = vld [vmem:[%s1474_s1 + $0x40] ss:$8 sps:$4 sm:$0xff] (!%p190_p2)  }
   0x9   : > { %v1023_v10 = vld [vmem:[%s1474_s1 + $0x54] ss:$8 sps:$4 sm:$0xff] (!%p190_p2)   ;;  %v1025_v11 = vld [vmem:[%s1474_s1 + $0x50] ss:$8 sps:$4 sm:$0xff] (!%p190_p2)   ;;  %v1026_v12 = vld [vmem:[%s1474_s1 + $0x64] ss:$8 sps:$4 sm:$0xff] (!%p190_p2)  }
   0xa   : > { %v1028_v15 = vld [vmem:[%s1474_s1 + $0x60] ss:$8 sps:$4 sm:$0xff] (!%p190_p2)   ;;  %v1029_v16 = vld [vmem:[%s1474_s1 + $0x74] ss:$8 sps:$4 sm:$0xff] (!%p190_p2)   ;;  %v1056_v18 = vld [vmem:[%s1476_s3 + $0x4] ss:$8 sps:$4 sm:$0xff] (!%p190_p2)  }
   0xb   : > { %444 = vmatpush1.bf16.msra.mxu0 (!%p190_p2), %v1013_v3  ;;  %v1058_v19 = vld [vmem:[%s1476_s3] ss:$8 sps:$4 sm:$0xff] (!%p190_p2)   ;;  %v1059_v20 = vld [vmem:[%s1476_s3 + $0x14] ss:$8 sps:$4 sm:$0xff] (!%p190_p2)   ;;  %694 = vmatprep.subr.bf16.mxu1 (!%p190_p2), %v1056_v18  ;;  %v1061_v21 = vld [vmem:[%s1476_s3 + $0x10] ss:$8 sps:$4 sm:$0xff] (!%p190_p2)  }
   0xc   : > { %445 = vmatprep.subr.bf16.mxu0 (!%p190_p2), %v1014_v4  ;;  %695 = vmatpush1.bf16.msra.mxu1 (!%p190_p2), %v1058_v19  ;;  %v1031_v22 = vld [vmem:[%s1474_s1 + $0x70] ss:$8 sps:$4 sm:$0xff] (!%p190_p2)   ;;  %v1062_v23 = vld [vmem:[%s1476_s3 + $0x24] ss:$8 sps:$4 sm:$0xff] (!%p190_p2)   ;;  %v1064_v25 = vld [vmem:[%s1476_s3 + $0x20] ss:$8 sps:$4 sm:$0xff] (!%p190_p2)  }
   0xd   : > { %s1480_s30 = smov (!%p219_p3, %s926_s30), 7  ;;  %696 = vmatprep.subr.bf16.mxu1 %v1059_v20  ;;  %v1032_v24 = vld [vmem:[%s1474_s1 + $0x84] ss:$8 sps:$4 sm:$0xff]   ;;  %v1034_v26 = vld [vmem:[%s1474_s1 + $0x80] ss:$8 sps:$4 sm:$0xff]  }
   0xe   : > { %s997_s16 = sshll.u32 %s1480_s30, 4  ;;  %v1065_v27 = vld [vmem:[%s1476_s3 + $0x34] ss:$8 sps:$4 sm:$0xff]   ;;  %v1067_v29 = vld [vmem:[%s1476_s3 + $0x30] ss:$8 sps:$4 sm:$0xff]   ;;  %s930_s23 = sshll.u32 %s1480_s30, 3 }
   0xf   : > { %446 = vmatpush1.bf16.msra.mxu0 %v1016_v5  ;;  %s1203_s22 = scalar_lea.vmem %s1473_s0, %s997_s16  ;;  %v1035_v28 = vld [vmem:[%s1474_s1 + $0x94] ss:$8 sps:$4 sm:$0xff]   ;;  %v1037_v30 = vld [vmem:[%s1474_s1 + $0x90] ss:$8 sps:$4 sm:$0xff]   ;;  %v1068_v31 = vld [vmem:[%s1476_s3 + $0x44] ss:$8 sps:$4 sm:$0xff]   ;;  %s229_s26 = scalar_lea.vmem %s1478_s5, %s930_s23 }
  0x10   : > { %447 = vmatprep.subr.bf16.mxu0 %v1017_v6  ;;  %v1212_v13 = vld [vmem:[%s1203_s22 + $0x8] sm:$0xff]  ;;  %v1215_v14 = vld [vmem:[%s1203_s22 + $0x18] sm:$0xff]  ;;  %697 = vmatpush1.bf16.msra.mxu1 %v1061_v21  ;;  %v1337_v55 = vld [vmem:[%s1203_s22] sm:$0xff]  ;;  %v271_v6 = vlaneseq }
  0x11   : > { %v236_v17 = vpack.c.bf16 %v1215_v14, %v1212_v13  ;;  %698 = vmatprep.subr.bf16.mxu1 %v1062_v23  ;;  %v1038_v32 = vld [vmem:[%s1474_s1 + $0xa4] ss:$8 sps:$4 sm:$0xff]   ;;  %v1070_v33 = vld [vmem:[%s1476_s3 + $0x40] ss:$8 sps:$4 sm:$0xff]   ;;  %v1071_v35 = vld [vmem:[%s1476_s3 + $0x54] ss:$8 sps:$4 sm:$0xff]  }
  0x12   : > { %v1040_v34 = vld [vmem:[%s1474_s1 + $0xa0] ss:$8 sps:$4 sm:$0xff]   ;;  %v1041_v36 = vld [vmem:[%s1474_s1 + $0xb4] ss:$8 sps:$4 sm:$0xff]   ;;  %v1073_v37 = vld [vmem:[%s1476_s3 + $0x50] ss:$8 sps:$4 sm:$0xff]  }
  0x13   : > { %448 = vmatpush1.bf16.msra.mxu0 %v1019_v7  ;;  %473 = vmatprep.mubr.bf16.mxu0 %v236_v17  ;;  %v1043_v38 = vld [vmem:[%s1474_s1 + $0xb0] ss:$8 sps:$4 sm:$0xff]   ;;  %v1074_v39 = vld [vmem:[%s1476_s3 + $0x64] ss:$8 sps:$4 sm:$0xff]   ;;  %v1076_v41 = vld [vmem:[%s1476_s3 + $0x60] ss:$8 sps:$4 sm:$0xff]  }
  0x14   : > { %449 = vmatprep.subr.bf16.mxu0 %v1020_v8  ;;  %699 = vmatpush1.bf16.msra.mxu1 %v1064_v25  ;;  %v1044_v40 = vld [vmem:[%s1474_s1 + $0xc4] ss:$8 sps:$4 sm:$0xff]   ;;  %v1046_v42 = vld [vmem:[%s1474_s1 + $0xc0] ss:$8 sps:$4 sm:$0xff]   ;;  %v1077_v43 = vld [vmem:[%s1476_s3 + $0x74] ss:$8 sps:$4 sm:$0xff]  }
  0x15   : > { %700 = vmatprep.subr.bf16.mxu1 %v1065_v27  ;;  %v1047_v44 = vld [vmem:[%s1474_s1 + $0xd4] ss:$8 sps:$4 sm:$0xff]   ;;  %v1079_v45 = vld [vmem:[%s1476_s3 + $0x70] ss:$8 sps:$4 sm:$0xff]   ;;  %v1080_v47 = vld [vmem:[%s1476_s3 + $0x84] ss:$8 sps:$4 sm:$0xff]  }
  0x16   : > { %v1049_v46 = vld [vmem:[%s1474_s1 + $0xd0] ss:$8 sps:$4 sm:$0xff]   ;;  %v1050_v48 = vld [vmem:[%s1474_s1 + $0xe4] ss:$8 sps:$4 sm:$0xff]   ;;  %v1082_v49 = vld [vmem:[%s1476_s3 + $0x80] ss:$8 sps:$4 sm:$0xff]  }
  0x17   : > { %450 = vmatpush1.bf16.msra.mxu0 %v1022_v9  ;;  %v1052_v50 = vld [vmem:[%s1474_s1 + $0xe0] ss:$8 sps:$4 sm:$0xff]   ;;  %v1083_v51 = vld [vmem:[%s1476_s3 + $0x94] ss:$8 sps:$4 sm:$0xff]   ;;  %v1055_v53 = vld [vmem:[%s1474_s1 + $0xf0] ss:$8 sps:$4 sm:$0xff]  }
  0x18   : > { %451 = vmatprep.subr.bf16.mxu0 %v1023_v10  ;;  %701 = vmatpush1.bf16.msra.mxu1 %v1067_v29  ;;  %v1053_v52 = vld [vmem:[%s1474_s1 + $0xf4] ss:$8 sps:$4 sm:$0xff]   ;;  %v1085_v54 = vld [vmem:[%s1476_s3 + $0x90] ss:$8 sps:$4 sm:$0xff]   ;;  %v1086_v57 = vld [vmem:[%s1476_s3 + $0xa4] ss:$8 sps:$4 sm:$0xff]  }
  0x19   : > { %702 = vmatprep.subr.bf16.mxu1 %v1068_v31  ;;  %v1340_v56 = vld [vmem:[%s1203_s22 + $0x10] sm:$0xff]  ;;  %v1088_v59 = vld [vmem:[%s1476_s3 + $0xa0] ss:$8 sps:$4 sm:$0xff]   ;;  %v1092_v62 = vld [vmem:[%s1476_s3 + $0xc4] ss:$8 sps:$4 sm:$0xff]   ;;  %v272_v7 = vshrl.u32 %v271_v6, 7 }
  0x1a   : > { %v235_v58 = vpack.c.bf16 %v1340_v56, %v1337_v55  ;;  %v1089_v60 = vld [vmem:[%s1476_s3 + $0xb4] ss:$8 sps:$4 sm:$0xff]   ;;  %v1091_v61 = vld [vmem:[%s1476_s3 + $0xb0] ss:$8 sps:$4 sm:$0xff]   ;;  %v1094_v63 = vld [vmem:[%s1476_s3 + $0xc0] ss:$8 sps:$4 sm:$0xff]  }
  0x1b   : > { %452 = vmatpush1.bf16.msra.mxu0 %v1025_v11  ;;  %v1095_v0 = vld [vmem:[%s1476_s3 + $0xd4] ss:$8 sps:$4 sm:$0xff]   ;;  %v1097_v1 = vld [vmem:[%s1476_s3 + $0xd0] ss:$8 sps:$4 sm:$0xff]   ;;  %v1098_v2 = vld [vmem:[%s1476_s3 + $0xe4] ss:$8 sps:$4 sm:$0xff]  }
  0x1c   : > { %453 = vmatprep.subr.bf16.mxu0 %v1026_v12  ;;  %703 = vmatpush1.bf16.msra.mxu1 %v1070_v33  ;;  %v1100_v3 = vld [vmem:[%s1476_s3 + $0xe0] ss:$8 sps:$4 sm:$0xff]   ;;  %v1101_v4 = vld [vmem:[%s1476_s3 + $0xf4] ss:$8 sps:$4 sm:$0xff]   ;;  %v1103_v5 = vld [vmem:[%s1476_s3 + $0xf0] ss:$8 sps:$4 sm:$0xff]  }
  0x1d   : > { %704 = vmatprep.subr.bf16.mxu1 %v1071_v35  ;;  %v273_v8 = vsub.s32 0, %v272_v7  ;;  %v269_v9 = vld [vmem:[%s1475_s2] sm:$0x3]  ;;  %v277_v10 = vsub.s32 1, %v272_v7  ;;  %s1125_s22 = smov 64  }
  0x1e   : > { %v522_v29 = vld [vmem:[%s1477_s4] sm:$0x3] }
  0x1f   : > { %454 = vmatpush1.bf16.msra.mxu0 %v1028_v15  ;;  %v274_v11 = vrot.slane %v269_v9, %v273_v8  ;;  %v278_v12 = vrot.slane %v269_v9, %v277_v10  ;;  %v531_v33 = vrot.slane %v522_v29, %v277_v10 }
  0x20   : > { %455 = vmatprep.subr.bf16.mxu0 %v1029_v16  ;;  %705 = vmatpush1.bf16.msra.mxu1 %v1073_v37 }
  0x21   : > { %706 = vmatprep.subr.bf16.mxu1 %v1074_v39 }
  0x23   : > { %456 = vmatpush1.bf16.msra.mxu0 %v1031_v22 }
  0x24   : > { %457 = vmatprep.subr.bf16.mxu0 %v1032_v24  ;;  %707 = vmatpush1.bf16.msra.mxu1 %v1076_v41 }
  0x25   : > { %708 = vmatprep.subr.bf16.mxu1 %v1077_v43 }
  0x27   : > { %458 = vmatpush1.bf16.msra.mxu0 %v1034_v26 }
  0x28   : > { %459 = vmatprep.subr.bf16.mxu0 %v1035_v28  ;;  %709 = vmatpush1.bf16.msra.mxu1 %v1079_v45 }
  0x29   : > { %710 = vmatprep.subr.bf16.mxu1 %v1080_v47 }
  0x2b   : > { %460 = vmatpush1.bf16.msra.mxu0 %v1037_v30  ;;  %v527_v30 = vrot.slane %v522_v29, %v273_v8 }
  0x2c   : > { %461 = vmatprep.subr.bf16.mxu0 %v1038_v32  ;;  %711 = vmatpush1.bf16.msra.mxu1 %v1082_v49 }
  0x2d   : > { %712 = vmatprep.subr.bf16.mxu1 %v1083_v51 }
  0x2f   : > { %462 = vmatpush1.bf16.msra.mxu0 %v1040_v34 }
  0x30   : > { %463 = vmatprep.subr.bf16.mxu0 %v1041_v36  ;;  %713 = vmatpush1.bf16.msra.mxu1 %v1085_v54 }
  0x31   : > { %714 = vmatprep.subr.bf16.mxu1 %v1086_v57 }
  0x33   : > { %464 = vmatpush1.bf16.msra.mxu0 %v1043_v38 }
  0x34   : > { %465 = vmatprep.subr.bf16.mxu0 %v1044_v40  ;;  %715 = vmatpush1.bf16.msra.mxu1 %v1088_v59  ;;  %v1390_v40 = vand.u32 127, %v271_v6 }
  0x35   : > { %716 = vmatprep.subr.bf16.mxu1 %v1089_v60 }
  0x36   : > { %vm747_vm0 = vcmp.lt.s32.totalorder %v1390_v40, 32  ;;  %vm764_vm1 = vcmp.lt.s32.totalorder %v1390_v40, 64 }
  0x37   : > { %466 = vmatpush1.bf16.msra.mxu0 %v1046_v42 }
  0x38   : > { %467 = vmatprep.subr.bf16.mxu0 %v1047_v44  ;;  %717 = vmatpush1.bf16.msra.mxu1 %v1091_v61 }
  0x39   : > { %718 = vmatprep.subr.bf16.mxu1 %v1092_v62 }
  0x3b   : > { %468 = vmatpush1.bf16.msra.mxu0 %v1049_v46 }
  0x3c   : > { %469 = vmatprep.subr.bf16.mxu0 %v1050_v48  ;;  %719 = vmatpush1.bf16.msra.mxu1 %v1094_v63 }
  0x3d   : > { %720 = vmatprep.subr.bf16.mxu1 %v1095_v0 }
  0x3f   : > { %470 = vmatpush1.bf16.msra.mxu0 %v1052_v50 }
  0x40   : > { %471 = vmatprep.subr.bf16.mxu0 %v1053_v52  ;;  %721 = vmatpush1.bf16.msra.mxu1 %v1097_v1 }
  0x41   : > { %722 = vmatprep.subr.bf16.mxu1 %v1098_v2 }
  0x43   : > { %472 = vmatpush1.bf16.msra.mxu0 %v1055_v53 }
  0x44   : > { %723 = vmatpush1.bf16.msra.mxu1 %v1100_v3 }
  0x45   : > { %724 = vmatprep.subr.bf16.mxu1 %v1101_v4 }
  0x46   : > { %474 = vmatmul.mubr.bf16.vlgmr.msra.gmra.mrb[0].mxu0 %v235_v58 }
  0x48   : > { %725 = vmatpush1.bf16.msra.mxu1 %v1103_v5 }
 0x119   : > { %v475_v15 = vpop.f32.mrb[0].mxu0 }
 0x11a   : > { %v476_v16 = vadd.f32 %v475_v15, %v274_v11  ;;  %v477_v17 = vpop.f32.mrb[1].mxu0 }
 0x11b   : > { %v478_v18 = vadd.f32 %v477_v17, %v278_v12  ;;  %v479_v19 = vpop.f32.mrb[2].mxu0 }
 0x11c   : > { %v480_v20 = vadd.f32 %v479_v19, %v274_v11  ;;  %v481_v21 = vpop.f32.mrb[3].mxu0  ;;  %v484_v23 = vmax.f32 %v476_v16, 0.0 }
 0x11d   : > { %v482_v22 = vadd.f32 %v481_v21, %v278_v12  ;;  %v485_v25 = vmax.f32 %v478_v18, 0.0 }
 0x11e   : > { %v486_v24 = vmax.f32 %v480_v20, 0.0 }
 0x11f   : > { %v487_v26 = vmax.f32 %v482_v22, 0.0 }
 0x120   : > { %v488_v27 = vpack.c.bf16 %v486_v24, %v484_v23 }
 0x121   : > { %v489_v28 = vpack.c.bf16 %v487_v26, %v485_v25 }
 0x123   : > { %726 = vmatprep.mubr.bf16.mxu1 %v489_v28 }
 0x124   : > { %727 = vmatmul.mubr.bf16.vlgmr.msra.gmra.mrb[0].mxu1 %v488_v27 }
 0x1f7   : > { %v728_v31 = vpop.f32.mrb[0].mxu1 }
 0x1f8   : > { %v729_v32 = vadd.f32 %v728_v31, %v527_v30  ;;  %v730_v34 = vpop.f32.mrb[1].mxu1 }
 0x1f9   : > { %v732_v35 = vpop.f32.mrb[2].mxu1  ;;  %v731_v38 = vadd.f32 %v730_v34, %v531_v33 }
 0x1fa   : > { %v733_v36 = vadd.f32 %v732_v35, %v527_v30  ;;  %v734_v37 = vpop.f32.mrb[3].mxu1  ;;  %737 = vrot.lane.b32.xlu0 %v729_v32, %s1124_s21 }
 0x1fb   : > { %v735_v39 = vadd.f32 %v734_v37, %v531_v33 }
 0x1fc   : > { %739 = vrot.lane.b32.xlu1 %v733_v36, %s1124_s21 }
 0x1fe   : > { %741 = vrot.lane.b32.xlu0 %v731_v38, %s1124_s21 }
 0x200   : > { %743 = vrot.lane.b32.xlu1 %v735_v39, %s1124_s21 }
 0x26c   : > { %v738_v41 = vpop.permute.xlu0 %737 }
 0x26e   : > { %v740_v42 = vpop.permute.xlu1 %739 }
 0x270   : > { %v742_v43 = vpop.permute.xlu0 %741 }
 0x271   : > { %v748_v44 = vsel %vm747_vm0, %v738_v41, %v742_v43  ;;  %v750_v45 = vsel %vm747_vm0, %v742_v43, %v738_v41 }
 0x272   : > { %v752_v46 = vmax.f32 %v729_v32, %v750_v45  ;;  %v753_v47 = vmax.f32 %v731_v38, %v748_v44  ;;  %v744_v48 = vpop.permute.xlu1 %743 }
 0x273   : > { %v749_v49 = vsel %vm747_vm0, %v740_v42, %v744_v48  ;;  %v751_v50 = vsel %vm747_vm0, %v744_v48, %v740_v42 }
 0x274   : > { %756 = vrot.lane.b32.xlu0 %v752_v46, %s1125_s22  ;;  %760 = vrot.lane.b32.xlu1 %v753_v47, %s1125_s22  ;;  %v754_v51 = vmax.f32 %v733_v36, %v751_v50  ;;  %v755_v52 = vmax.f32 %v735_v39, %v749_v49 }
 0x278   : > { %758 = vrot.lane.b32.xlu0 %v754_v51, %s1125_s22  ;;  %762 = vrot.lane.b32.xlu1 %v755_v52, %s1125_s22 }
 0x2e6   : > { %v757_v53 = vpop.permute.xlu0 %756  ;;  %v761_v54 = vpop.permute.xlu1 %760 }
 0x2e7   : > { %v765_v57 = vsel %vm764_vm1, %v757_v53, %v761_v54  ;;  %v767_v58 = vsel %vm764_vm1, %v761_v54, %v757_v53 }
 0x2e8   : > { %v769_v59 = vmax.f32 %v752_v46, %v767_v58  ;;  %v770_v60 = vmax.f32 %v753_v47, %v765_v57 }
 0x2ea   : > { %v773_v61 = vmax.f32 %v769_v59, %v770_v60  ;;  %v759_v62 = vpop.permute.xlu0 %758  ;;  %v763_v63 = vpop.permute.xlu1 %762 }
 0x2eb   : > { %v766_v0 = vsel %vm764_vm1, %v759_v62, %v763_v63  ;;  %v768_v1 = vsel %vm764_vm1, %v763_v63, %v759_v62 }
 0x2ec   : > { %v775_v2 = vsub.f32 %v729_v32, %v773_v61  ;;  %v776_v3 = vsub.f32 %v731_v38, %v773_v61  ;;  %v771_v4 = vmax.f32 %v754_v51, %v768_v1  ;;  %v772_v5 = vmax.f32 %v755_v52, %v766_v0 }
 0x2ee   : > { %v779_v6 = vmul.f32 1.442695, %v775_v2  ;;  %v781_v7 = vmul.f32 1.442695, %v776_v3  ;;  %v774_v8 = vmax.f32 %v771_v4, %v772_v5 }
 0x2f0   : > { %1104 = vpow2.f32 %v779_v6  ;;  %v777_v9 = vsub.f32 %v733_v36, %v774_v8  ;;  %v778_v10 = vsub.f32 %v735_v39, %v774_v8 }
 0x2f1   : > { %1106 = vpow2.f32 %v781_v7 }
 0x2f2   : > { %v783_v11 = vmul.f32 1.442695, %v777_v9  ;;  %v785_v12 = vmul.f32 1.442695, %v778_v10 }
 0x2f4   : > { %1108 = vpow2.f32 %v783_v11 }
 0x2f5   : > { %1110 = vpow2.f32 %v785_v12 }
 0x2fa   : > { %v1105_v15 = vpop.eup %1104 }
 0x2fb   : > { %v1107_v16 = vpop.eup %1106  ;;  %787 = vrot.lane.b32.xlu0 %v1105_v15, %s1124_s21  ;;  %v821_v19 = vmul.f32 %v1105_v15, %v1337_v55 }
 0x2fc   : > { %791 = vrot.lane.b32.xlu1 %v1107_v16, %s1124_s21  ;;  %v822_v20 = vmul.f32 %v1107_v16, %v1212_v13 }
 0x2fe   : > { %v1109_v17 = vpop.eup %1108 }
 0x2ff   : > { %v1111_v18 = vpop.eup %1110  ;;  %789 = vrot.lane.b32.xlu0 %v1109_v17, %s1124_s21  ;;  %v823_v21 = vmul.f32 %v1109_v17, %v1340_v56 }
 0x300   : > { %793 = vrot.lane.b32.xlu1 %v1111_v18, %s1124_s21  ;;  %v824_v22 = vmul.f32 %v1111_v18, %v1215_v14 }
 0x303   : > { %825 = vrot.lane.b32.xlu0 %v821_v19, %s1124_s21 }
 0x304   : > { %829 = vrot.lane.b32.xlu1 %v822_v20, %s1124_s21 }
 0x307   : > { %827 = vrot.lane.b32.xlu0 %v823_v21, %s1124_s21 }
 0x308   : > { %831 = vrot.lane.b32.xlu1 %v824_v22, %s1124_s21 }
 0x36d   : > { %v788_v23 = vpop.permute.xlu0 %787 }
 0x36e   : > { %v792_v24 = vpop.permute.xlu1 %791 }
 0x36f   : > { %v795_v25 = vsel %vm747_vm0, %v788_v23, %v792_v24  ;;  %v797_v13 = vsel %vm747_vm0, %v792_v24, %v788_v23 }
 0x370   : > { %v799_v55 = vadd.f32 %v1105_v15, %v797_v13  ;;  %v800_v26 = vadd.f32 %v1107_v16, %v795_v25 }
 0x371   : > { %v790_v27 = vpop.permute.xlu0 %789 }
 0x372   : > { %803 = vrot.lane.b32.xlu0 %v799_v55, %s1125_s22  ;;  %807 = vrot.lane.b32.xlu1 %v800_v26, %s1125_s22  ;;  %v794_v14 = vpop.permute.xlu1 %793 }
 0x373   : > { %v796_v56 = vsel %vm747_vm0, %v790_v27, %v794_v14  ;;  %v798_v28 = vsel %vm747_vm0, %v794_v14, %v790_v27 }
 0x374   : > { %v801_v29 = vadd.f32 %v1109_v17, %v798_v28  ;;  %v802_v30 = vadd.f32 %v1111_v18, %v796_v56 }
 0x375   : > { %v826_v31 = vpop.permute.xlu0 %825 }
 0x376   : > { %805 = vrot.lane.b32.xlu0 %v801_v29, %s1125_s22  ;;  %809 = vrot.lane.b32.xlu1 %v802_v30, %s1125_s22  ;;  %v830_v32 = vpop.permute.xlu1 %829 }
 0x377   : > { %v833_v33 = vsel %vm747_vm0, %v826_v31, %v830_v32  ;;  %v835_v34 = vsel %vm747_vm0, %v830_v32, %v826_v31 }
 0x378   : > { %v837_v35 = vadd.f32 %v835_v34, %v821_v19  ;;  %v838_v36 = vadd.f32 %v833_v33, %v822_v20 }
 0x379   : > { %v828_v37 = vpop.permute.xlu0 %827 }
 0x37a   : > { %841 = vrot.lane.b32.xlu0 %v837_v35, %s1125_s22  ;;  %845 = vrot.lane.b32.xlu1 %v838_v36, %s1125_s22  ;;  %v832_v38 = vpop.permute.xlu1 %831 }
 0x37b   : > { %v834_v39 = vsel %vm747_vm0, %v828_v37, %v832_v38  ;;  %v836_v41 = vsel %vm747_vm0, %v832_v38, %v828_v37 }
 0x37c   : > { %v839_v42 = vadd.f32 %v836_v41, %v823_v21  ;;  %v840_v43 = vadd.f32 %v834_v39, %v824_v22 }
 0x37e   : > { %843 = vrot.lane.b32.xlu0 %v839_v42, %s1125_s22  ;;  %847 = vrot.lane.b32.xlu1 %v840_v43, %s1125_s22 }
 0x3e4   : > { %v804_v44 = vpop.permute.xlu0 %803  ;;  %v808_v45 = vpop.permute.xlu1 %807 }
 0x3e5   : > { %v811_v46 = vsel %vm764_vm1, %v804_v44, %v808_v45  ;;  %v813_v47 = vsel %vm764_vm1, %v808_v45, %v804_v44 }
 0x3e6   : > { %v815_v48 = vadd.f32 %v813_v47, %v799_v55  ;;  %v816_v49 = vadd.f32 %v811_v46, %v800_v26 }
 0x3e8   : > { %v819_v50 = vadd.f32 %v816_v49, %v815_v48  ;;  %v806_v51 = vpop.permute.xlu0 %805  ;;  %v810_v52 = vpop.permute.xlu1 %809 }
 0x3e9   : > { %v812_v53 = vsel %vm764_vm1, %v806_v51, %v810_v52  ;;  %v814_v54 = vsel %vm764_vm1, %v810_v52, %v806_v51 }
 0x3ea   : > { %1112 = vrcp.f32 %v819_v50  ;;  %v817_v57 = vadd.f32 %v814_v54, %v801_v29  ;;  %v818_v58 = vadd.f32 %v812_v53, %v802_v30 }
 0x3ec   : > { %v820_v59 = vadd.f32 %v818_v58, %v817_v57  ;;  %v842_v60 = vpop.permute.xlu0 %841  ;;  %v846_v61 = vpop.permute.xlu1 %845 }
 0x3ed   : > { %v849_v62 = vsel %vm764_vm1, %v842_v60, %v846_v61  ;;  %v851_v63 = vsel %vm764_vm1, %v846_v61, %v842_v60 }
 0x3ee   : > { %1114 = vrcp.f32 %v820_v59  ;;  %v853_v0 = vadd.f32 %v851_v63, %v837_v35  ;;  %v854_v1 = vadd.f32 %v849_v62, %v838_v36 }
 0x3f0   : > { %v844_v2 = vpop.permute.xlu0 %843  ;;  %v848_v3 = vpop.permute.xlu1 %847  ;;  %v857_v6 = vadd.f32 %v854_v1, %v853_v0 }
 0x3f1   : > { %v850_v4 = vsel %vm764_vm1, %v844_v2, %v848_v3  ;;  %v852_v5 = vsel %vm764_vm1, %v848_v3, %v844_v2 }
 0x3f2   : > { %v855_v7 = vadd.f32 %v852_v5, %v839_v42  ;;  %v856_v8 = vadd.f32 %v850_v4, %v840_v43 }
 0x3f4   : > { %v1113_v9 = vpop.eup %1112  ;;  %v858_v11 = vadd.f32 %v856_v8, %v855_v7 }
 0x3f5   : > { %v861_v10 = vmul.f32 %v1113_v9, %v857_v6 }
 0x3f7   : > { %863 = vst [vmem:[%s229_s26] sm:$0xff] %v861_v10 }
 0x3f8   : > { %v1115_v12 = vpop.eup %1114 }
 0x3f9   : > { %v862_v15 = vmul.f32 %v1115_v12, %v858_v11 }
 0x3fb   : > { %864 = vst [vmem:[%s229_s26 + $0x8] sm:$0xff] %v862_v15 }
 0x3fc PF: > { %s15_s18 = sadd.s32 1, %s1122_s18  }
 0x3fd   : > { %p12_p4 = scmp.ge.s32.totalorder %s15_s18, 6  }
 0x3ff   :  { %14 = sbr.rel (!%p12_p4) target bundleno = 1 (0x1), region = 70 }

</bundles_post_ra>
